<compile_context>
chip_gen: v7x
topology: tpu7x:2x2x1
jax: 0.10.0
libtpu: 0.0.40
codegen_flags: <defaults>
</compile_context>

<pallas_src>
import functools

import jax
import jax.numpy as jnp
from jax.experimental import pallas as pl
from jax.experimental.pallas import tpu as pltpu


def _channel_agg_kernel(x_ref, o_ref, *, t_real):
    # x_ref: (1, TC, T) in VMEM; o_ref: (1, 3, TC, T) in VMEM.
    x = x_ref[0, :, :]                                     # (TC, T), input dtype
    x32 = x.astype(jnp.float32)

    # Two-pass moments in f32 (time = lane-axis reduction). Free under the
    # HBM store roofline and numerically robust (|mean| >> std cases).
    mean = jnp.sum(x32, axis=-1, keepdims=True) * (1.0 / t_real)     # (TC, 1)
    d = x32 - mean
    # Unbiased variance (Bessel, divide by T-1), matching torch.std default.
    inv_tm1 = (1.0 / (t_real - 1)) if t_real > 1 else float("nan")   # T==1 -> NaN (torch parity)
    var = jnp.sum(d * d, axis=-1, keepdims=True) * inv_tm1           # (TC, 1), >= 0
    std = jnp.sqrt(var)

    out_dtype = o_ref.dtype
    shp = x.shape
    # Three lane-dense (TC, T) stores; broadcasts hoisted (once per tile).
    o_ref[0, 0, :, :] = x.astype(out_dtype)
    o_ref[0, 1, :, :] = jnp.broadcast_to(mean.astype(out_dtype), shp)
    o_ref[0, 2, :, :] = jnp.broadcast_to(std.astype(out_dtype), shp)


def _vmem_plan():
    """Per-generation VMEM plan: explicit limit + I/O double-buffer budget."""
    cap = 128 << 20  # physical VMEM per TensorCore on v5e/v6e; v7x reports 64 MiB
    try:
        cap = int(getattr(pltpu.get_tpu_info(), "vmem_capacity_bytes", cap)) or cap
    except Exception:
        pass
    # Use at most half of physical VMEM: 48 MiB on v5e/v6e, 32 MiB on v7x.
    vmem_limit = int(min(cap // 2, 48 << 20))
    # Half of that for the 2 x (in_tile + 3*out_tile) double buffers; the rest
    # covers f32 elementwise temporaries and Mosaic internal scratch.
    io_budget = vmem_limit // 2
    return vmem_limit, io_budget


def channel_aggregation(x, *, max_channel_tile=512):
    """x: (B, C, T) -> (B, 3C, T) = concat([x, mean, std], axis=1), std unbiased."""
    B, C, T = x.shape
    itemsize = jnp.dtype(x.dtype).itemsize
    vmem_limit, io_budget = _vmem_plan()

    # Channel-tile alignment = sublanes per vreg for this dtype (8 f32, 16 bf16).
    c_align = max(8, 32 // itemsize)

    # Double-buffered I/O footprint per grid step: 2*(in + 3*out) = 8*TC*T*itemsize.
    # TODO(synk): for extremely long T (footprint > budget even at TC=c_align),
    # tile the time axis too with a two-pass reduce; not needed for ECAPA shapes.
    tc_fit = io_budget // (8 * T * itemsize)
    tc_fit = max(c_align, (tc_fit // c_align) * c_align)
    TC = int(min(tc_fit, max_channel_tile))
    if TC >= C:
        # Single full-dim channel block (exempt from the 8-sublane rule).
        TC = C
        if B == 1 and C > c_align:
            # Guarantee >= 2 grid steps so both v7x TensorCores share the HBM BW.
            TC = ((pl.cdiv(C, 2) + c_align - 1) // c_align) * c_align

    grid = (B, pl.cdiv(C, TC))

    # Advisory cost for XLA's scheduler: 1 read + 3 writes, ~3 flops/elem, one sqrt/row.
    cost = pl.CostEstimate(
        flops=3 * B * C * T,
        transcendentals=B * C,
        bytes_accessed=4 * B * C * T * itemsize,
    )

    out = pl.pallas_call(
        functools.partial(_channel_agg_kernel, t_real=T),
        out_shape=jax.ShapeDtypeStruct((B, 3, C, T), x.dtype),
        grid=grid,
        in_specs=[pl.BlockSpec((1, TC, T), lambda b, c: (b, c, 0))],
        out_specs=pl.BlockSpec((1, 3, TC, T), lambda b, c: (b, 0, c, 0)),
        compiler_params=pltpu.CompilerParams(
            dimension_semantics=("parallel", "parallel"),
            vmem_limit_bytes=vmem_limit),
        cost_estimate=cost,
    )(x)

    # (B, 3, C, T) -> (B, 3C, T): free contiguous reshape == torch.cat order.
    return out.reshape(B, 3 * C, T)


def _reference(x):
    t = x.shape[-1]
    mean = jnp.mean(x, axis=-1, keepdims=True)
    var = jnp.sum((x - mean) ** 2, axis=-1, keepdims=True) / (t - 1)
    std = jnp.sqrt(var)
    return jnp.concatenate(
        [x, jnp.broadcast_to(mean, x.shape), jnp.broadcast_to(std, x.shape)],
        axis=1)


if __name__ == "__main__":
    key = jax.random.PRNGKey(0)
    k1, k2, k3 = jax.random.split(key, 3)

    # Small shape consistent with the module's forward (B, C, T).
    B, C, T = 2, 4, 16
    x = jax.random.normal(k1, (B, C, T), dtype=jnp.float32)
    out = jax.block_until_ready(channel_aggregation(x))
    ref = _reference(x)
    assert out.shape == (B, 3 * C, T), out.shape
    assert jnp.allclose(out, ref, atol=1e-5, rtol=1e-5), "mismatch vs reference"

    # Unaligned C and T: exercises the full-dim (non-8/128-multiple) block path.
    B2, C2, T2 = 2, 20, 200
    x2 = jax.random.normal(k2, (B2, C2, T2), dtype=jnp.float32)
    out2 = jax.block_until_ready(channel_aggregation(x2))
    ref2 = _reference(x2)
    assert out2.shape == (B2, 3 * C2, T2), out2.shape
    assert jnp.allclose(out2, ref2, atol=1e-5, rtol=1e-5), "mismatch (unaligned)"

    # B == 1: channel-split path (>= 2 grid steps for v7x) with a ragged tail block.
    B3, C3, T3 = 1, 20, 200
    x3 = jax.random.normal(k3, (B3, C3, T3), dtype=jnp.float32)
    out3 = jax.block_until_ready(channel_aggregation(x3))
    ref3 = _reference(x3)
    assert out3.shape == (B3, 3 * C3, T3), out3.shape
    assert jnp.allclose(out3, ref3, atol=1e-5, rtol=1e-5), "mismatch (ragged tail)"

    print("KERNEL_OK")
</pallas_src>

<mosaic_0001>
module attributes {stable_mosaic.version = 11 : i64} {
  func.func @_channel_agg_kernel(%arg0: i32, %arg1: i32, %arg2: memref<1x4x16xf32, #tpu.memory_space<vmem>>, %arg3: memref<1x3x4x16xf32, #tpu.memory_space<vmem>>) attributes {dimension_semantics = [#tpu.dimension_semantics<parallel>, #tpu.dimension_semantics<parallel>], iteration_bounds = array<i64: 2, 1>, scalar_prefetch = 0 : i64, scratch_operands = 0 : i64, tpu.core_type = #tpu.core_type<tc>, window_params = [{transform_indices = @transform_0, window_bounds = array<i64: 1, 4, 16>}, {transform_indices = @transform_1, window_bounds = array<i64: 1, 3, 4, 16>}]} {
    %c0 = arith.constant 0 : index
    %c0_0 = arith.constant 0 : index
    %c0_1 = arith.constant 0 : index
    %0 = vector.load %arg2[%c0, %c0_0, %c0_1] : memref<1x4x16xf32, #tpu.memory_space<vmem>>, vector<1x4x16xf32>
    %1 = vector.shape_cast %0 : vector<1x4x16xf32> to vector<4x16xf32>
    %cst = arith.constant dense<0.000000e+00> : vector<4xf32>
    %2 = vector.multi_reduction <add>, %1, %cst [1] : vector<4x16xf32> to vector<4xf32>
    %3 = vector.shape_cast %2 : vector<4xf32> to vector<4x1xf32>
    %cst_2 = arith.constant 6.250000e-02 : f32
    %4 = vector.broadcast %cst_2 : f32 to vector<4x1xf32>
    %5 = arith.mulf %3, %4 : vector<4x1xf32>
    %6 = vector.broadcast %5 : vector<4x1xf32> to vector<4x16xf32>
    %7 = arith.subf %1, %6 : vector<4x16xf32>
    %8 = arith.mulf %7, %7 : vector<4x16xf32>
    %cst_3 = arith.constant dense<0.000000e+00> : vector<4xf32>
    %9 = vector.multi_reduction <add>, %8, %cst_3 [1] : vector<4x16xf32> to vector<4xf32>
    %10 = vector.shape_cast %9 : vector<4xf32> to vector<4x1xf32>
    %cst_4 = arith.constant 0.0666666701 : f32
    %11 = vector.broadcast %cst_4 : f32 to vector<4x1xf32>
    %12 = arith.mulf %10, %11 : vector<4x1xf32>
    %13 = math.sqrt %12 : vector<4x1xf32>
    %c0_5 = arith.constant 0 : index
    %c0_6 = arith.constant 0 : index
    %c0_7 = arith.constant 0 : index
    %c0_8 = arith.constant 0 : index
    %14 = vector.load %arg3[%c0_5, %c0_6, %c0_7, %c0_8] : memref<1x3x4x16xf32, #tpu.memory_space<vmem>>, vector<1x1x4x16xf32>
    %15 = vector.shape_cast %14 : vector<1x1x4x16xf32> to vector<4x16xf32>
    %16 = vector.shape_cast %1 : vector<4x16xf32> to vector<1x1x4x16xf32>
    tpu.vector_store %arg3[%c0_5, %c0_6, %c0_7, %c0_8], %16 {strides = array<i32>} : memref<1x3x4x16xf32, #tpu.memory_space<vmem>>, vector<1x1x4x16xf32>,
    %17 = vector.shape_cast %5 : vector<4x1xf32> to vector<4x1xf32>
    %18 = vector.broadcast %17 : vector<4x1xf32> to vector<4x16xf32>
    %c0_9 = arith.constant 0 : index
    %c1 = arith.constant 1 : index
    %c0_10 = arith.constant 0 : index
    %c0_11 = arith.constant 0 : index
    %19 = vector.load %arg3[%c0_9, %c1, %c0_10, %c0_11] : memref<1x3x4x16xf32, #tpu.memory_space<vmem>>, vector<1x1x4x16xf32>
    %20 = vector.shape_cast %19 : vector<1x1x4x16xf32> to vector<4x16xf32>
    %21 = vector.shape_cast %18 : vector<4x16xf32> to vector<1x1x4x16xf32>
    tpu.vector_store %arg3[%c0_9, %c1, %c0_10, %c0_11], %21 {strides = array<i32>} : memref<1x3x4x16xf32, #tpu.memory_space<vmem>>, vector<1x1x4x16xf32>,
    %22 = vector.shape_cast %13 : vector<4x1xf32> to vector<4x1xf32>
    %23 = vector.broadcast %22 : vector<4x1xf32> to vector<4x16xf32>
    %c0_12 = arith.constant 0 : index
    %c2 = arith.constant 2 : index
    %c0_13 = arith.constant 0 : index
    %c0_14 = arith.constant 0 : index
    %24 = vector.load %arg3[%c0_12, %c2, %c0_13, %c0_14] : memref<1x3x4x16xf32, #tpu.memory_space<vmem>>, vector<1x1x4x16xf32>
    %25 = vector.shape_cast %24 : vector<1x1x4x16xf32> to vector<4x16xf32>
    %26 = vector.shape_cast %23 : vector<4x16xf32> to vector<1x1x4x16xf32>
    tpu.vector_store %arg3[%c0_12, %c2, %c0_13, %c0_14], %26 {strides = array<i32>} : memref<1x3x4x16xf32, #tpu.memory_space<vmem>>, vector<1x1x4x16xf32>,
    return
  }
  func.func @transform_0(%arg0: i32, %arg1: i32) -> (i32, i32, i32) {
    %c0_i32 = arith.constant 0 : i32
    %c0_i32_0 = arith.constant 0 : i32
    return %arg0, %arg1, %c0_i32 : i32, i32, i32
  }
  func.func @transform_1(%arg0: i32, %arg1: i32) -> (i32, i32, i32, i32) {
    %c0_i32 = arith.constant 0 : i32
    %c0_i32_0 = arith.constant 0 : i32
    %c0_i32_1 = arith.constant 0 : i32
    return %arg0, %c0_i32, %arg1, %c0_i32_0 : i32, i32, i32, i32
  }
}

</mosaic_0001>

<bundles_post_ra>
// kernel: tpu_custom_call.1
= control target key start
LH: loop header
LB: loop body
LE: loop exit
PB: predicated region body
PF: predicated region fallthrough
CT: control target
= control target key end

     0   :  { %6 = vsyncpa [#allocation3], 0  ;;  %s661_s0 = inlined_call_operand.hbm [shape: f32[2,4,16], index: 0, kind: input, shape index: {}]   ;;  %s662_s1 = inlined_call_operand.hbm [shape: f32[2,3,4,16], index: 1, kind: output, shape index: {}]  }
   0x1   :  { %8 = vsyncpa [#allocation3 + $0x1], 0 }
   0x2   :  { %9 = vsyncpa [#allocation4], 0 }
   0x3   :  { %11 = vsyncpa [#allocation4 + $0x1], 0  ;;  %s481_s6 = smov 0   ;;  %s483_s7 = smov 0  }
   0x4   :  { %s485_s8 = smov 0   ;;  %s487_s9 = smov 0  }
   0x5   :  { %s489_s10 = smov 0   ;;  %s491_s11 = smov 0  }
   0x6 LB: > { %s272_s12 = sadd.s32 4294967295, %s465_s11   ;;  %s273_s13 = sadd.s32 4294967294, %s465_s11   ;;  %s465_s11 = sphi %s491_s11, %s17_s11   ;;  %s461_s10 = sphi %s489_s10, %s678_s10   ;;  %s457_s9 = sphi %s487_s9, %s677_s9   ;;  %s453_s8 = sphi %s485_s8, %s676_s8   ;;  %s449_s7 = sphi %s483_s7, %s675_s7   ;;  %s445_s6 = sphi %s481_s6, %s674_s6  }
   0x7   : > { %s29_s14 = sadd.s32 1, %s461_s10  ;;  %s38_s15 = sadd.s32 1, %s453_s8 }
   0x8   : > { %p31_p0 = scmp.ge.s32.totalorder %s29_s14, 2  ;;  %p45_p1 = scmp.ne.s32.totalorder %s453_s8, %s449_s7 }
   0x9   : > { %p46_p2 = scmp.eq.s32.totalorder %s465_s11, 0  ;;  %p51_p3 = scmp.ne.s32.totalorder %s449_s7, %s445_s6 }
   0xa   : > { %s680_s14 = smov (%p31_p0, %s29_s14), 0  ;;  %p52_p5 = scmp.eq.s32.totalorder %s272_s12, 0 }
   0xb   : > { %p522_p4 = por %p46_p2, %p45_p1  ;;  %s33_s17 = ssub.s32 %s461_s10, %s680_s14 }
   0xc   : > { %p77_p6 = scmp.eq.s32.totalorder %s272_s12, 1  ;;  %p36_p7 = scmp.eq.s32.totalorder %s33_s17, 0 }
   0xd   : > { %p528_p8 = por %p52_p5, %p51_p3  ;;  %p83_p10 = scmp.eq.s32.totalorder %s273_s13, 1 }
   0xe   : > { %p532_p9 = por %p77_p6, %p45_p1  ;;  %p299_p13 = scmp.lt.s32.totalorder %s465_s11, 2 }
   0xf   : > { %s537_s20 = scalar_select %p36_p7, %s453_s8, %s38_s15  }
  0x10   : > { %s666_s19 = scalar_select %p532_p9, 1, 0 }
  0x11   : > { %p539_p11 = por %p83_p10, %p51_p3  ;;  %s103_s22 = sand.u32 1, %s453_s8  }
  0x12   : > { %s276_s23 = sshll.u32 %s103_s22, 2  ;;  %s277_s24 = sshll.u32 %s461_s10, 6 }
  0x13   : > { %s667_s21 = scalar_select %p539_p11, 1, 0 }
  0x14   : > { %s550_s27 = scalar_lea.hbm %s661_s0, %s277_s24  ;;  %s107_s28 = scalar_lea.vmem [#allocation2], %s276_s23 }
  0x15   : > { %s115_s29 = sshll.u32 %s107_s28, 4  ;;  %p556_p0 = pnand %p299_p13, %p522_p4  ;;  %s552_s29 = int_to_ptr.vmem [resolvable:$true] %s115_s29 }
  0x16   : > { %s104_s2 = scalar_lea.sflag [#allocation3], %s103_s22  ;;  %s353_s3 = scalar_lea.hbm %s550_s27, 64 }
  0x17   : > { %p354_p3 = scmp.ne.s32.totalorder %s550_s27, %s353_s3  ;;  %p355_p5 = pneg %p556_p0 }
  0x18   : > { %s358_s12 = scalar_lea.hbm %s661_s0, 128  ;;  %p359_p4 = scmp.lt.u32.totalorder %s550_s27, %s661_s0 }
  0x19   : > { %p356_p6 = pnand %p355_p5, %p354_p3  ;;  %p360_p10 = scmp.lt.u32.totalorder %s358_s12, %s353_s3 }
  0x1a   : > { %p362_p12 = scmp.lt.u32.totalorder %s353_s3, %s550_s27 }
  0x1b   : > { %p357_p7 = pneg %p356_p6  ;;  %p361_p13 = por %p360_p10, %p359_p4 }
  0x1d   : > { %p363_p1 = por %p362_p12, %p361_p13 }
  0x1f   : > { %p364_p2 = pnand %p363_p1, %p357_p7 }
  0x21   : > { %367 = shalt.err (!%p364_p2)
}
  0x22   : > { %s368_s16 = scalar_lea.vmem %s552_s29, 64  ;;  %s467_s17 = smov [#allocation2]  }
  0x23   : > { %p369_p3 = scmp.ne.s32.totalorder %s552_s29, %s368_s16  ;;  %s373_s22 = sshll.u32 %s467_s17, 4  ;;  %s374_s22 = int_to_ptr.vmem [resolvable:$false] %s373_s22 }
  0x24   : > { %s375_s23 = scalar_lea.vmem %s374_s22, 128  ;;  %p376_p9 = scmp.lt.s32.totalorder %s552_s29, %s374_s22 }
  0x25   : > { %p371_p6 = pnand %p369_p3, %p355_p5  ;;  %p377_p4 = scmp.lt.s32.totalorder %s375_s23, %s368_s16 }
  0x27   : > { %p372_p11 = pneg %p371_p6  ;;  %p378_p10 = por %p377_p4, %p376_p9 }
  0x29   : > { %p379_p12 = pnand %p378_p10, %p372_p11 }
  0x2b   : > { %382 = shalt.err (!%p379_p12)
}
  0x2c   : > { %294 = dma.hbm_to_vmem [thread:$0]  (!%p556_p0), %s550_s27, 64, %s552_s29, %s104_s2  }
  0x2d   : > { %p669_p1 = scmp.lt.s32.totalorder %s465_s11, 3  ;;  %p670_p2 = scmp.ge.s32.totalorder %s465_s11, 1 }
  0x2f   : > { %p121_p5 = pnand %p670_p2, %p669_p1 }
  0x30   : > { %s592_s24 = sand.u32 (!%p121_p5), 1, %s449_s7  }
  0x31   : > { %124 = sbr.rel (%p121_p5) target bundleno = 382 (0x17e), region = 24  ;;  %s279_s25 = sshll.u32 (!%p121_p5), %s592_s24, 2 }
  0x32   : > { %s127_s26 = scalar_lea.sflag (!%p121_p5), [#allocation3], %s592_s24  ;;  %s130_s28 = scalar_lea.vmem (!%p121_p5), [#allocation2], %s279_s25 }
  0x38   : > { %436 = dma.done.wait (%p528_p8), %s127_s26, 64  }
  0x39   : > { %438 = vsyncadd (%p528_p8), %s127_s26, 4294967232  ;;  %s285_s27 = smul.u32 12, %s592_s24  ;;  %vm150_vm0 = vcmask 125952   ;;  %v149_v0 = vld [vmem:[%s130_s28] sm:$0xf]  ;;  %p671_p9 = scmp.ne.s32.totalorder %s666_s19, 0 }
  0x3a   : > { %v151_v1 = vsel %vm150_vm0, %v149_v0, 0.0  ;;  %s286_s30 = smul.u32 192, %s457_s9  ;;  %s174_s9 = scalar_lea.sflag [#allocation4], %s592_s24 }
  0x3b   : > { %s148_s29 = scalar_lea.vmem [#allocation5], %s285_s27  ;;  %152 = vadd.xlane.f32.xlu0 %v151_v1  ;;  %s468_s12 = smov [#allocation5]  }
  0x3c   : > { %168 = vst.msk [vmem:[%s148_s29] sm:$0xf] %vm150_vm0, %v149_v0  ;;  %s188_s18 = sshll.u32 %s148_s29, 4  ;;  %s611_s4 = scalar_lea.hbm %s662_s1, %s286_s30  ;;  %s606_s18 = int_to_ptr.vmem [resolvable:$true] %s188_s18 }
  0x3d   : > { %s383_s5 = scalar_lea.vmem %s606_s18, 192  ;;  %s387_s13 = sshll.u32 %s468_s12, 4  ;;  %s388_s13 = int_to_ptr.vmem [resolvable:$false] %s387_s13 }
  0x3e   : > { %p384_p8 = scmp.ne.s32.totalorder %s606_s18, %s383_s5  ;;  %s389_s15 = scalar_lea.vmem %s388_s13, 384 }
  0x3f   : > { %p390_p7 = scmp.lt.s32.totalorder %s606_s18, %s388_s13  ;;  %p391_p13 = scmp.lt.s32.totalorder %s389_s15, %s383_s5 }
  0x40   : > { %p385_p11 = pnand %p384_p8, %p671_p9 }
  0x41   : > { %p392_p3 = por %p391_p13, %p390_p7 }
  0x42   : > { %p386_p0 = pneg %p385_p11 }
  0x44   : > { %p393_p6 = pnand %p392_p3, %p386_p0 }
  0xc8   : > { %v153_v2 = vpop.xlane.xlu0 %152 }
  0xc9   : > { %v154_v3 = vmul.f32 0.0625, %v153_v2 }
  0xcb   : > { %v155_v4 = vsub.f32 %v149_v0, %v154_v3  ;;  %280 = vst.msk [vmem:[%s148_s29 + $0x4] sm:$0xf] %vm150_vm0, %v154_v3 }
  0xcd   : > { %v156_v5 = vmul.f32 %v155_v4, %v155_v4 }
  0xcf   : > { %v157_v6 = vsel %vm150_vm0, %v156_v5, 0.0 }
  0xd0   : > { %158 = vadd.xlane.f32.xlu0 %v157_v6 }
 0x15d   : > { %v159_v7 = vpop.xlane.xlu0 %158 }
 0x15e   : > { %v160_v8 = vmul.f32 0.06666667, %v159_v7 }
 0x160   : > { %351 = vrsqrt.f32 %v160_v8  ;;  %vm163_vm1 = vcmp.eq.f32.partialorder %v160_v8, inf  ;;  %v166_v11 = vand.u32 2147483648, %v160_v8  ;;  %vm165_vm2 = vcmp.eq.f32.partialorder %v160_v8, 0.0 }
 0x16a   : > { %v352_v9 = vpop.eup %351 }
 0x16b   : > { %v162_v10 = vmul.f32 %v352_v9, %v160_v8 }
 0x16d   : > { %v164_v12 = vsel %vm163_vm1, %v160_v8, %v162_v10 }
 0x16e   : > { %v167_v13 = vsel %vm165_vm2, %v166_v11, %v164_v12 }
 0x16f   : > { %281 = vst.msk [vmem:[%s148_s29 + $0x8] sm:$0xf] %vm150_vm0, %v167_v13 }
 0x170   : > { %396 = shalt.err (!%p393_p6)
}
 0x171   : > { %s397_s16 = scalar_lea.hbm %s611_s4, 192  ;;  %s401_s23 = scalar_lea.hbm %s662_s1, 384 }
 0x172   : > { %p398_p4 = scmp.ne.s32.totalorder %s611_s4, %s397_s16  ;;  %p402_p1 = scmp.lt.u32.totalorder %s611_s4, %s662_s1 }
 0x173   : > { %p403_p2 = scmp.lt.u32.totalorder %s401_s23, %s397_s16  ;;  %p405_p8 = scmp.lt.u32.totalorder %s397_s16, %s611_s4 }
 0x174   : > { %p399_p10 = pnand %p398_p4, %p671_p9 }
 0x175   : > { %p404_p5 = por %p403_p2, %p402_p1 }
 0x176   : > { %p400_p12 = pneg %p399_p10 }
 0x177   : > { %p406_p11 = por %p405_p8, %p404_p5 }
 0x179   : > { %p407_p0 = pnand %p406_p11, %p400_p12 }
 0x17b   : > { %410 = shalt.err (!%p407_p0)
}
 0x17c   : > { %s469_s28 = smov 64   ;;  %s470_s27 = smov 4  }
 0x17d   : > { %289 = dma.vmem_to_hbm [thread:$0]  (%p671_p9), %s606_s18, 192, %s611_s4, %s174_s9, %s469_s28, %s469_s28, %s470_s27  }
 0x17e PF: > { %s203_s29 = sand.u32 1, %s445_s6   ;;  %p672_p7 = scmp.ne.s32.totalorder %s667_s21, 0 }
 0x17f   : > { %p673_p13 = scmp.ge.s32.totalorder %s465_s11, 2  ;;  %s204_s30 = scalar_lea.sflag [#allocation4], %s203_s29 }
 0x181   : > { %p296_p3 = pnand %p673_p13, %p672_p7 }
 0x183   : > { %440 = dma.done.wait (!%p296_p3), %s204_s30, 192  }
 0x184   : > { %442 = vsyncadd (!%p296_p3), %s204_s30, 4294967104  ;;  %s17_s11 = sadd.s32 1, %s465_s11   ;;  %s674_s6 = smov %s449_s7 }
 0x185   : > { %p14_p6 = scmp.ge.s32.totalorder %s17_s11, 4   ;;  %s675_s7 = smov %s453_s8 }
 0x186   : > { %s676_s8 = smov %s537_s20  ;;  %s677_s9 = smov %s461_s10 }
 0x187   : > { %s678_s10 = smov %s680_s14  ;;  %16 = sbr.rel (!%p14_p6) target bundleno = 6 (0x6), region = 71 }
 0x18e   :  { %209 = vsyncpa [#allocation3], 1 }
 0x18f   :  { %211 = vsyncpa [#allocation3 + $0x1], 1 }
 0x190   :  { %212 = vsyncpa [#allocation4], 1 }
 0x191   :  { %214 = vsyncpa [#allocation4 + $0x1], 1 }

</bundles_post_ra>
